<compile_context>
chip_gen: v5e
topology: v5e:2x2
jax: 0.10.0
libtpu: 0.0.40
codegen_flags: <defaults>
</compile_context>

<pallas_src>
import functools

import jax
import jax.numpy as jnp
from jax.experimental import pallas as pl
from jax.experimental.pallas import tpu as pltpu


def _round_up(x, m):
    return ((x + m - 1) // m) * m


def _vmem_capacity_bytes():
    try:
        info = pltpu.get_tpu_info()
        cap = getattr(info, "vmem_capacity_bytes", None)
        if cap:
            return int(cap)
    except Exception:
        pass
    # Conservative fallback (v7x per-TensorCore VMEM).  tb is capped at the
    # HBM sweet spot anyway, so under-reporting on v5e/v6e costs little.
    return 64 * 1024 * 1024


def _mask_sce_kernel(x_ref, t_ref, m_ref, loss_ref, cnt_ref, *, batch_size):
    i = pl.program_id(0)
    tb = x_ref.shape[0]

    x = x_ref[...].astype(jnp.float32)          # (tb, C)
    t = t_ref[...].astype(jnp.float32)          # (tb, C)
    m = m_ref[...].astype(jnp.float32)          # (tb, 1)

    # Rows of the last (partial) tile past the real batch hold unspecified
    # data; build an in-kernel row-validity mask (do NOT trust the mask block
    # contents for those rows).
    row_ids = jax.lax.broadcasted_iota(jnp.int32, (tb, 1), 0) + i * tb
    valid = row_ids < batch_size                # (tb, 1) bool

    # t-side reductions do not depend on the max/exp chain.
    t_sum = jnp.sum(t, axis=-1, keepdims=True)          # (tb, 1)
    tx_sum = jnp.sum(t * x, axis=-1, keepdims=True)     # (tb, 1)

    # Numerically-stable logsumexp.
    x_max = jnp.max(x, axis=-1, keepdims=True)
    sum_exp = jnp.sum(jnp.exp(x - x_max), axis=-1, keepdims=True)
    lse = x_max + jnp.log(sum_exp)                       # (tb, 1)

    # sum(-t * (x - lse)) == lse * sum(t) - sum(t * x)
    row_loss = lse * t_sum - tx_sum                      # (tb, 1)

    # where-select (not multiply) so garbage rows cannot inject NaN/Inf.
    loss_ref[...] = jnp.where(valid, row_loss * m, 0.0)
    cnt_ref[...] = jnp.where(valid, m, 0.0)


def _make_input_spec(block_shape, index_map, nbuf):
    if nbuf > 2 and hasattr(pl, "Buffered"):
        try:
            return pl.BlockSpec(block_shape, index_map,
                                pipeline_mode=pl.Buffered(nbuf))
        except TypeError:
            pass
    return pl.BlockSpec(block_shape, index_map)


def mask_soft_target_cross_entropy(x, target, mask, *, tb=None):
    """x: (B, C) logits, target: (B, C) soft targets, mask: (B,) of {0, 1}."""
    B, C = x.shape
    assert target.shape == (B, C)
    assert mask.shape == (B,)

    in_itemsize = max(jnp.dtype(x.dtype).itemsize,
                      jnp.dtype(target.dtype).itemsize)
    cap = _vmem_capacity_bytes()
    vmem_limit = max(32 * 1024 * 1024, int(cap * 3 // 4))

    if tb is None:
        # HBM roofline flattens around a few MiB of input per grid step; do
        # not push tb to the VMEM limit.
        sweet_bytes = 6 * 1024 * 1024
        tb_dma = max(8, sweet_bytes // (2 * C * in_itemsize))
        # VMEM cap: up to triple-buffered inputs + ~4 live f32 (tb, C) temps.
        row_bytes = C * (3 * 2 * in_itemsize + 4 * 4) + 64
        tb_vmem = max(8, int(vmem_limit * 0.6) // row_bytes)
        tb = min(tb_dma, tb_vmem, 4096)
    tb = min(tb, _round_up(B, 8))
    tb = max(8, (tb // 8) * 8)

    grid_b = pl.cdiv(B, tb)

    # Deeper input pipelining only where VMEM is plentiful (v5e/v6e, 128 MiB)
    # and the grid is deep enough to benefit; never on v7x's 64 MiB.
    nbuf = 3 if (cap >= 100 * 1024 * 1024 and grid_b >= 3) else 2

    mask_col = mask.astype(jnp.float32).reshape(B, 1)

    kernel = functools.partial(_mask_sce_kernel, batch_size=B)

    loss_rows, cnt_rows = pl.pallas_call(
        kernel,
        out_shape=(
            jax.ShapeDtypeStruct((grid_b * tb, 1), jnp.float32),
            jax.ShapeDtypeStruct((grid_b * tb, 1), jnp.float32),
        ),
        grid_spec=pltpu.PrefetchScalarGridSpec(
            num_scalar_prefetch=0,
            grid=(grid_b,),
            in_specs=[
                _make_input_spec((tb, C), lambda i: (i, 0), nbuf),
                _make_input_spec((tb, C), lambda i: (i, 0), nbuf),
                pl.BlockSpec((tb, 1), lambda i: (i, 0)),
            ],
            out_specs=[
                pl.BlockSpec((tb, 1), lambda i: (i, 0)),
                pl.BlockSpec((tb, 1), lambda i: (i, 0)),
            ],
        ),
        compiler_params=pltpu.CompilerParams(
            dimension_semantics=("parallel",),
            vmem_limit_bytes=vmem_limit,
        ),
    )(x, target, mask_col)

    total = jnp.sum(loss_rows)
    count = jnp.sum(cnt_rows)
    # NOTE: count == 0 (all rows masked out) yields NaN, matching torch.mean
    # over an empty selection.
    return total / count


def _reference(x, target, mask):
    x = x.astype(jnp.float32)
    target = target.astype(jnp.float32)
    log_sm = jax.nn.log_softmax(x, axis=-1)
    row_loss = jnp.sum(-target * log_sm, axis=-1)
    m = mask.astype(jnp.float32)
    return jnp.sum(row_loss * m) / jnp.sum(m)


if __name__ == "__main__":
    key = jax.random.PRNGKey(0)
    k1, k2, k3 = jax.random.split(key, 3)

    # Small shapes consistent with the module: B x nb_classes logits/targets.
    B, C = 16, 32
    x = jax.random.normal(k1, (B, C), dtype=jnp.float32)
    target = jax.nn.softmax(jax.random.normal(k2, (B, C), dtype=jnp.float32),
                            axis=-1)
    mask = (jax.random.uniform(k3, (B,)) > 0.4).astype(jnp.int32)
    # Ensure at least one row is kept (empty selection is NaN in torch too).
    mask = mask.at[0].set(1)

    loss = mask_soft_target_cross_entropy(x, target, mask)
    jax.block_until_ready(loss)
    ref = _reference(x, target, mask)
    assert jnp.allclose(loss, ref, atol=1e-5, rtol=1e-5), (loss, ref)

    # Second check: non-128 class count and batch not divisible by the row
    # tile (exercises the partial last tile + in-kernel row-validity mask,
    # and a multi-step grid).
    k4, k5, k6 = jax.random.split(jax.random.PRNGKey(1), 3)
    B2, C2 = 37, 50
    x2 = jax.random.normal(k4, (B2, C2), dtype=jnp.float32)
    t2 = jax.nn.softmax(jax.random.normal(k5, (B2, C2), dtype=jnp.float32),
                        axis=-1)
    m2 = (jax.random.uniform(k6, (B2,)) > 0.5).astype(jnp.int32)
    m2 = m2.at[0].set(1)
    loss2 = mask_soft_target_cross_entropy(x2, t2, m2, tb=8)
    jax.block_until_ready(loss2)
    ref2 = _reference(x2, t2, m2)
    assert jnp.allclose(loss2, ref2, atol=1e-5, rtol=1e-5), (loss2, ref2)

    print("KERNEL_OK")
</pallas_src>

<mosaic_0001>
module attributes {stable_mosaic.version = 11 : i64} {
  func.func @_mask_sce_kernel(%arg0: i32, %arg1: memref<16x32xf32, #tpu.memory_space<vmem>>, %arg2: memref<16x32xf32, #tpu.memory_space<vmem>>, %arg3: memref<16x1xf32, #tpu.memory_space<vmem>>, %arg4: memref<16x1xf32, #tpu.memory_space<vmem>>, %arg5: memref<16x1xf32, #tpu.memory_space<vmem>>) attributes {dimension_semantics = [#tpu.dimension_semantics<parallel>], iteration_bounds = array<i64: 1>, scalar_prefetch = 0 : i64, scratch_operands = 0 : i64, tpu.core_type = #tpu.core_type<tc>, window_params = [{transform_indices = @transform_0, window_bounds = array<i64: 16, 32>}, {transform_indices = @transform_1, window_bounds = array<i64: 16, 32>}, {transform_indices = @transform_2, window_bounds = array<i64: 16, 1>}, {transform_indices = @transform_3, window_bounds = array<i64: 16, 1>}, {transform_indices = @transform_4, window_bounds = array<i64: 16, 1>}]} {
    %c0 = arith.constant 0 : index
    %c0_0 = arith.constant 0 : index
    %0 = vector.load %arg1[%c0, %c0_0] : memref<16x32xf32, #tpu.memory_space<vmem>>, vector<16x32xf32>
    %c0_1 = arith.constant 0 : index
    %c0_2 = arith.constant 0 : index
    %1 = vector.load %arg2[%c0_1, %c0_2] : memref<16x32xf32, #tpu.memory_space<vmem>>, vector<16x32xf32>
    %c0_3 = arith.constant 0 : index
    %c0_4 = arith.constant 0 : index
    %2 = vector.load %arg3[%c0_3, %c0_4] : memref<16x1xf32, #tpu.memory_space<vmem>>, vector<16x1xf32>
    %3 = tpu.iota {dimensions = array<i32: 0>} : vector<16x1xi32>
    %c16_i32 = arith.constant 16 : i32
    %4 = arith.muli %arg0, %c16_i32 : i32
    %5 = vector.broadcast %4 : i32 to vector<16x1xi32>
    %6 = arith.addi %3, %5 : vector<16x1xi32>
    %c16_i32_5 = arith.constant 16 : i32
    %7 = vector.broadcast %c16_i32_5 : i32 to vector<16x1xi32>
    %8 = arith.cmpi slt, %6, %7 : vector<16x1xi32>
    %cst = arith.constant dense<0.000000e+00> : vector<16xf32>
    %9 = vector.multi_reduction <add>, %1, %cst [1] : vector<16x32xf32> to vector<16xf32>
    %10 = vector.shape_cast %9 : vector<16xf32> to vector<16x1xf32>
    %11 = arith.mulf %1, %0 : vector<16x32xf32>
    %cst_6 = arith.constant dense<0.000000e+00> : vector<16xf32>
    %12 = vector.multi_reduction <add>, %11, %cst_6 [1] : vector<16x32xf32> to vector<16xf32>
    %13 = vector.shape_cast %12 : vector<16xf32> to vector<16x1xf32>
    %cst_7 = arith.constant dense<0xFF800000> : vector<16xf32>
    %14 = vector.multi_reduction <maximumf>, %0, %cst_7 [1] : vector<16x32xf32> to vector<16xf32>
    %15 = vector.shape_cast %14 : vector<16xf32> to vector<16x1xf32>
    %16 = vector.broadcast %15 : vector<16x1xf32> to vector<16x32xf32>
    %17 = arith.subf %0, %16 : vector<16x32xf32>
    %18 = math.exp %17 : vector<16x32xf32>
    %cst_8 = arith.constant dense<0.000000e+00> : vector<16xf32>
    %19 = vector.multi_reduction <add>, %18, %cst_8 [1] : vector<16x32xf32> to vector<16xf32>
    %20 = vector.shape_cast %19 : vector<16xf32> to vector<16x1xf32>
    %21 = math.log %20 : vector<16x1xf32>
    %22 = arith.addf %15, %21 : vector<16x1xf32>
    %23 = arith.mulf %22, %10 : vector<16x1xf32>
    %24 = arith.subf %23, %13 : vector<16x1xf32>
    %25 = arith.mulf %24, %2 : vector<16x1xf32>
    %cst_9 = arith.constant 0.000000e+00 : f32
    %26 = vector.broadcast %cst_9 : f32 to vector<16x1xf32>
    %27 = arith.select %8, %25, %26 : vector<16x1xi1>, vector<16x1xf32>
    %c0_10 = arith.constant 0 : index
    %c0_11 = arith.constant 0 : index
    %28 = vector.load %arg4[%c0_10, %c0_11] : memref<16x1xf32, #tpu.memory_space<vmem>>, vector<16x1xf32>
    tpu.vector_store %arg4[%c0_10, %c0_11], %27 {strides = array<i32>} : memref<16x1xf32, #tpu.memory_space<vmem>>, vector<16x1xf32>,
    %cst_12 = arith.constant 0.000000e+00 : f32
    %29 = vector.broadcast %cst_12 : f32 to vector<16x1xf32>
    %30 = arith.select %8, %2, %29 : vector<16x1xi1>, vector<16x1xf32>
    %c0_13 = arith.constant 0 : index
    %c0_14 = arith.constant 0 : index
    %31 = vector.load %arg5[%c0_13, %c0_14] : memref<16x1xf32, #tpu.memory_space<vmem>>, vector<16x1xf32>
    tpu.vector_store %arg5[%c0_13, %c0_14], %30 {strides = array<i32>} : memref<16x1xf32, #tpu.memory_space<vmem>>, vector<16x1xf32>,
    return
  }
  func.func @transform_0(%arg0: i32) -> (i32, i32) {
    %c0_i32 = arith.constant 0 : i32
    %c0_i32_0 = arith.constant 0 : i32
    return %arg0, %c0_i32 : i32, i32
  }
  func.func @transform_1(%arg0: i32) -> (i32, i32) {
    %c0_i32 = arith.constant 0 : i32
    %c0_i32_0 = arith.constant 0 : i32
    return %arg0, %c0_i32 : i32, i32
  }
  func.func @transform_2(%arg0: i32) -> (i32, i32) {
    %c0_i32 = arith.constant 0 : i32
    %c0_i32_0 = arith.constant 0 : i32
    return %arg0, %c0_i32 : i32, i32
  }
  func.func @transform_3(%arg0: i32) -> (i32, i32) {
    %c0_i32 = arith.constant 0 : i32
    %c0_i32_0 = arith.constant 0 : i32
    return %arg0, %c0_i32 : i32, i32
  }
  func.func @transform_4(%arg0: i32) -> (i32, i32) {
    %c0_i32 = arith.constant 0 : i32
    %c0_i32_0 = arith.constant 0 : i32
    return %arg0, %c0_i32 : i32, i32
  }
}

</mosaic_0001>

<bundles_post_ra>
// kernel: tpu_custom_call.1
= control target key start
LH: loop header
LB: loop body
LE: loop exit
PB: predicated region body
PF: predicated region fallthrough
CT: control target
= control target key end

     0   :  { %10 = vsyncpa [#allocation3], 0  ;;  %s147_s18 = smov [#allocation2]   ;;  %s148_s20 = smov 128   ;;  %s214_s0 = inlined_call_operand.vmem [shape: f32[16,32], index: 0, kind: input, shape index: {}]   ;;  %s215_s1 = inlined_call_operand.hbm [shape: f32[16,32], index: 1, kind: input, shape index: {}]   ;;  %s216_s2 = inlined_call_operand.vmem [shape: f32[16,1], index: 2, kind: input, shape index: {}]   ;;  %s217_s3 = inlined_call_operand.vmem [shape: f32[16,1], index: 3, kind: output, shape index: {0}]   ;;  %s218_s4 = inlined_call_operand.vmem [shape: f32[16,1], index: 4, kind: output, shape index: {1}]  }
   0x1   :  { %s17_s17 = sshll.u32 %s215_s1, 4  ;;  %s19_s19 = sshll.u32 %s147_s18, 4  ;;  %s18_s17 = int_to_ptr.hbm [resolvable:$true] %s17_s17  ;;  %s20_s19 = int_to_ptr.vmem [resolvable:$true] %s19_s19 }
   0x2   :  { %s149_s21 = smov 8  }
   0x3   :  { %25 = dma.hbm_to_vmem [thread:$0]  %s18_s17, 256, %s20_s19, [#allocation3], %s148_s20, %s148_s20, %s149_s21  }
   0x4   :  { %145 = dma.done.wait [#allocation3], 256  }
   0x5   :  { %146 = vsyncadd [#allocation3], 4294967040  ;;  %vm47_vm0 = vcmask 261120   ;;  %v32_v0 = vld [vmem:[%s214_s0] sm:$0xff]  ;;  %v33_v2 = vld [vmem:[%s214_s0 + $0x8] sm:$0xff]  ;;  %vm94_vm1 = vcmask 7168  }
   0x6   :  { %v62_v1 = vsel %vm47_vm0, %v32_v0, -inf  ;;  %v65_v3 = vsel %vm47_vm0, %v33_v2, -inf  ;;  %v34_v4 = vld [vmem:[#allocation2] sm:$0xff]  ;;  %v35_v8 = vld [vmem:[#allocation2 + $0x8] sm:$0xff] }
   0x7   :  { %63 = vmax.xlane.f32.xlu0 %v62_v1  ;;  %v48_v5 = vsel %vm47_vm0, %v34_v4, 0.0  ;;  %v54_v6 = vmul.f32 %v34_v4, %v32_v0  ;;  %v51_v9 = vsel %vm47_vm0, %v35_v8, 0.0  ;;  %v55_v20 = vmul.f32 %v35_v8, %v33_v2  ;;  %v36_v22 = vld [vmem:[%s216_s2] sm:$0xff]  ;;  %v37_v23 = vld [vmem:[%s216_s2 + $0x8] sm:$0xff] }
   0x8   :  { %49 = vadd.xlane.f32.xlu2 %v48_v5  ;;  %99 = vst.msk [vmem:[%s218_s4] sm:$0xff] %vm94_vm1, %v36_v22 }
   0x9   :  { %v56_v7 = vsel %vm47_vm0, %v54_v6, 0.0  ;;  %v59_v21 = vsel %vm47_vm0, %v55_v20, 0.0  ;;  %100 = vst.msk [vmem:[%s218_s4 + $0x8] sm:$0xff] %vm94_vm1, %v37_v23 }
   0xf   :  { %66 = vmax.xlane.f32.xlu0 %v65_v3 }
  0x10   :  { %52 = vadd.xlane.f32.xlu2 %v51_v9 }
  0x17   :  { %57 = vadd.xlane.f32.xlu0 %v56_v7 }
  0x7a   :  { %v64_v10 = vpop.xlane.xlu0 %63 }
  0x7b   :  { %v68_v11 = vsub.f32 %v32_v0, %v64_v10  ;;  %v50_v26 = vpop.xlane.xlu2 %49 }
  0x7d   :  { %v70_v12 = vmul.f32 1.442695, %v68_v11 }
  0x7f   :  { %113 = vpow2.f32 %v70_v12 }
  0x82   :  { %v67_v13 = vpop.xlane.xlu0 %66 }
  0x83   :  { %v69_v14 = vsub.f32 %v33_v2, %v67_v13  ;;  %v53_v36 = vpop.xlane.xlu2 %52 }
  0x85   :  { %v114_v15 = vpop.eup %113  ;;  %v72_v16 = vmul.f32 1.442695, %v69_v14 }
  0x86   :  { %v74_v17 = vsel %vm47_vm0, %v114_v15, 0.0 }
  0x87   :  { %115 = vpow2.f32 %v72_v16  ;;  %75 = vadd.xlane.f32.xlu1 %v74_v17 }
  0x8a   :  { %v58_v30 = vpop.xlane.xlu0 %57 }
  0x8d   :  { %v116_v18 = vpop.eup %115 }
  0x8e   :  { %v77_v19 = vsel %vm47_vm0, %v116_v18, 0.0 }
  0x8f   :  { %78 = vadd.xlane.f32.xlu1 %v77_v19 }
  0x97   :  { %60 = vadd.xlane.f32.xlu1 %v59_v21 }
  0xfa   :  { %v76_v24 = vpop.xlane.xlu1 %75 }
  0xfb   :  { %117 = vlog2.f32 %v76_v24 }
 0x101   :  { %v118_v25 = vpop.eup %117 }
 0x102   :  { %v81_v27 = vmul.f32 0.6931472, %v118_v25  ;;  %v79_v28 = vpop.xlane.xlu1 %78 }
 0x103   :  { %119 = vlog2.f32 %v79_v28 }
 0x104   :  { %v84_v29 = vadd.f32 %v81_v27, %v64_v10 }
 0x106   :  { %v86_v31 = vmul.f32 %v84_v29, %v50_v26 }
 0x108   :  { %v88_v32 = vsub.f32 %v86_v31, %v58_v30 }
 0x109   :  { %v120_v33 = vpop.eup %119 }
 0x10a   :  { %v83_v34 = vmul.f32 0.6931472, %v120_v33  ;;  %v90_v35 = vmul.f32 %v88_v32, %v36_v22  ;;  %v61_v38 = vpop.xlane.xlu1 %60 }
 0x10c   :  { %95 = vst.msk [vmem:[%s217_s3] sm:$0xff] %vm94_vm1, %v90_v35  ;;  %v85_v37 = vadd.f32 %v83_v34, %v67_v13 }
 0x10e   :  { %v87_v39 = vmul.f32 %v85_v37, %v53_v36 }
 0x110   :  { %v89_v40 = vsub.f32 %v87_v39, %v61_v38 }
 0x112   :  { %v91_v41 = vmul.f32 %v89_v40, %v37_v23 }
 0x114   :  { %96 = vst.msk [vmem:[%s217_s3 + $0x8] sm:$0xff] %vm94_vm1, %v91_v41 }
 0x115   :  { %109 = vsyncpa [#allocation3], 1 }

</bundles_post_ra>
